<compile_context>
chip_gen: v7x
topology: tpu7x:2x2x1
jax: 0.10.0
libtpu: 0.0.40
codegen_flags: <defaults>
</compile_context>

<pallas_src>
import functools
import math

import jax
import jax.numpy as jnp
from jax import lax
from jax.experimental import pallas as pl
from jax.experimental.pallas import tpu as pltpu

_LANE = 128
_BN_EPS = 1e-5


def _vmem_budget_bytes():
    """Chip-aware VMEM budget: at most half of physical VMEM (headroom for the
    compiler).  v5e/v6e: 128 MiB -> 64 MiB; v7x: 64 MiB -> 32 MiB."""
    cap = 64 << 20
    try:
        info = pltpu.get_tpu_info()
        cap = int(getattr(info, "vmem_capacity_bytes", cap)) or cap
    except Exception:
        pass
    return max(16 << 20, cap // 2)


def _pool_sum_kernel(x_ref, o_ref, *, hw, hw_block, lane_w, n_slices, n_par,
                     tiles_per_split, needs_mask, unroll):
    """Spatial partial-sum kernel.  grid = (row_tile, split, hw_tile).

    x_ref : (rb, hw_block)    row-packed input tile (native dtype)
    o_ref : (1, rb, lane_w)   f32 lane-resident partial sums; the output block is
                              revisited across the innermost ("arbitrary") axis.
    """
    p = pl.program_id(1)                 # parallel split of the HW axis
    s = pl.program_id(2)                 # spatial tile within this split

    @pl.when(s == 0)
    def _init():
        o_ref[...] = jnp.zeros_like(o_ref)

    t = p * tiles_per_split + s          # logical spatial tile index
    tile_base = t * hw_block             # first column this tile covers
    rb = o_ref.shape[1]

    def full_tile():
        # Unmasked hot path: per-128-lane load+cast straight from the ref,
        # tree-combined into n_par independent partials (bounded live vregs).
        if n_slices == 1:
            o_ref[0] += x_ref[...].astype(jnp.float32)
            return

        n_groups = n_slices // n_par

        def body(g, parts):
            base = g * (n_par * lane_w)
            new = []
            for j in range(n_par):
                st = base + j * lane_w
                if lane_w == _LANE:
                    st = pl.multiple_of(st, _LANE)
                new.append(parts[j] +
                           x_ref[:, pl.ds(st, lane_w)].astype(jnp.float32))
            return tuple(new)

        init = tuple(jnp.zeros((rb, lane_w), jnp.float32) for _ in range(n_par))
        parts = lax.fori_loop(0, n_groups, body, init, unroll=unroll)
        if n_par == 4:
            total = (parts[0] + parts[1]) + (parts[2] + parts[3])
        elif n_par == 2:
            total = parts[0] + parts[1]
        else:
            total = parts[0]
        o_ref[0] += total

    if not needs_mask:
        full_tile()
        return

    def masked_tile():
        # Ragged last tile (and fully out-of-range overshoot tiles of the split):
        # mask lanes whose global column index >= HW.  jnp.where (not x*mask) so
        # unspecified out-of-bounds data never propagates.
        iota = lax.broadcasted_iota(jnp.int32, (rb, lane_w), 1)
        if n_slices == 1:
            col = tile_base + iota
            o_ref[0] += jnp.where(col < hw, x_ref[...].astype(jnp.float32), 0.0)
            return

        def body(c, acc):
            st = c * lane_w
            if lane_w == _LANE:
                st = pl.multiple_of(st, _LANE)
            col = tile_base + c * lane_w + iota
            sl = x_ref[:, pl.ds(st, lane_w)].astype(jnp.float32)
            return acc + jnp.where(col < hw, sl, 0.0)

        acc = lax.fori_loop(0, n_slices, body,
                            jnp.zeros((rb, lane_w), jnp.float32))
        o_ref[0] += acc

    last_col = tile_base + hw_block

    @pl.when(last_col <= hw)
    def _full():
        full_tile()

    @pl.when(last_col > hw)
    def _ragged():
        masked_tile()


def scale_channel_attention(x_nchw, w1, w2, gamma, beta, running_mean, running_var,
                            *, hw_block=None, n_splits=None,
                            target_step_bytes=4 << 20, row_block_cap=32,
                            input_buffers=2):
    """x_nchw: (N, C_in, H, W).  w1: (C_mid, C_in), w2: (C_out, C_mid).
    Returns (N, C_out, 1, 1) matching the PyTorch module (inference)."""
    N, C_in, H, W = x_nchw.shape
    HW = H * W
    R = N * C_in
    itemsize = jnp.dtype(x_nchw.dtype).itemsize
    vmem_budget = _vmem_budget_bytes()

    # ---- Row tiling (row-packed (N*C_in, HW) layout: no sublane waste for small C_in).
    cap = max(8, (int(row_block_cap) // 8) * 8)
    rb = R if R <= cap else cap
    num_row_tiles = pl.cdiv(R, rb)
    r_pad = num_row_tiles * rb

    # ---- Spatial tiling: hw_block from a bytes-per-grid-step target (~4 MiB),
    # bounded by the multi-buffered VMEM budget and by HW itself (no padding).
    if HW >= _LANE:
        lane_w = _LANE
        max_by_hw = (HW // _LANE) * _LANE
        if hw_block is None:
            by_tgt = (int(target_step_bytes) // (rb * itemsize)) // _LANE * _LANE
            n_bufs = max(2, int(input_buffers))
            by_vmem = ((vmem_budget // 2) // (n_bufs * rb * itemsize)) // _LANE * _LANE
            hw_block = max(_LANE, min(by_tgt, by_vmem, max_by_hw))
        assert hw_block % _LANE == 0 and _LANE <= hw_block <= max_by_hw, hw_block
    else:
        lane_w = HW            # tiny spatial extent: single full-width tile
        hw_block = HW
    n_slices = hw_block // lane_w

    nt = pl.cdiv(HW, hw_block)                     # total spatial tiles (no pad)
    # ---- Parallel split of the HW axis: gives the 2nd v7x TensorCore work when
    # all rows fit a single row tile (harmless on 1-TC chips).
    if n_splits is None:
        n_splits = 2 if (num_row_tiles == 1 and nt >= 2) else 1
    n_splits = max(1, min(int(n_splits), nt))
    tps = pl.cdiv(nt, n_splits)                    # hw tiles per split
    overshoot = n_splits * tps > nt
    needs_mask = (HW % hw_block != 0) or overshoot

    n_par = 4 if n_slices % 4 == 0 else (2 if n_slices % 2 == 0 else 1)
    unroll = 2 if (n_slices // n_par) >= 2 else 1

    x2 = x_nchw.reshape(R, HW)                     # pure view, no extra HBM pass

    kernel = functools.partial(
        _pool_sum_kernel, hw=HW, hw_block=hw_block, lane_w=lane_w,
        n_slices=n_slices, n_par=n_par, tiles_per_split=tps,
        needs_mask=needs_mask, unroll=unroll)

    nt_m1 = nt - 1

    def x_index_map(r, p, s):
        t = p * tps + s
        if overshoot:
            # Clamp fully out-of-range logical tiles to the last valid block;
            # the in-kernel iota mask zeroes their contribution.
            t = jnp.minimum(t, nt_m1)
        return (r, t)

    spec_kwargs = {}
    if int(input_buffers) != 2:                    # pipeline-depth sweep knob
        spec_kwargs["pipeline_mode"] = pl.Buffered(int(input_buffers))

    grid_spec = pltpu.PrefetchScalarGridSpec(
        num_scalar_prefetch=0,
        grid=(num_row_tiles, n_splits, tps),
        in_specs=[pl.BlockSpec((rb, hw_block), x_index_map, **spec_kwargs)],
        out_specs=pl.BlockSpec((1, rb, lane_w), lambda r, p, s: (p, r, 0)),
    )

    cost = pl.CostEstimate(
        flops=int(R * HW),
        transcendentals=0,
        bytes_accessed=int(R * HW * itemsize + n_splits * r_pad * lane_w * 4),
    )

    part_sums = pl.pallas_call(
        kernel,
        out_shape=jax.ShapeDtypeStruct((n_splits, r_pad, lane_w), jnp.float32),
        grid_spec=grid_spec,
        compiler_params=pltpu.CompilerParams(
            dimension_semantics=("parallel", "parallel", "arbitrary"),
            vmem_limit_bytes=int(vmem_budget),
        ),
        cost_estimate=cost,
    )(x2)

    # ---- Tiny tail (fc1 -> inference BN -> ReLU -> fc2 -> exact softmax) in XLA:
    # one batched matmul chain instead of N separate M=1 dots inside the kernel.
    pooled = (part_sums.sum(axis=(0, 2))[:R].reshape(N, C_in)
              * jnp.float32(1.0 / HW))                             # (N, C_in)
    h = pooled @ jnp.asarray(w1, jnp.float32).T                    # fc1
    inv_std = lax.rsqrt(jnp.asarray(running_var, jnp.float32) + _BN_EPS)
    h = (h - jnp.asarray(running_mean, jnp.float32)) * (
        jnp.asarray(gamma, jnp.float32) * inv_std) + jnp.asarray(beta, jnp.float32)
    h = jnp.maximum(h, 0.0)                                        # ReLU
    y = h @ jnp.asarray(w2, jnp.float32).T                         # fc2
    y = jax.nn.softmax(y, axis=-1)                                 # exact softmax
    return y[:, :, None, None]


def _init_params(key, in_planes, out_planes, num_features):
    """Mirror _initialize_weights(): kaiming_normal_(mode='fan_out', relu) for the
    1x1 convs, BN gamma=1, beta=0, running stats 0/1."""
    k1, k2 = jax.random.split(key)
    std1 = math.sqrt(2.0 / out_planes)     # fan_out of a 1x1 conv = out_channels
    std2 = math.sqrt(2.0 / num_features)
    w1 = jax.random.normal(k1, (out_planes, in_planes), jnp.float32) * std1
    w2 = jax.random.normal(k2, (num_features, out_planes), jnp.float32) * std2
    gamma = jnp.ones((out_planes,), jnp.float32)
    beta = jnp.zeros((out_planes,), jnp.float32)
    running_mean = jnp.zeros((out_planes,), jnp.float32)
    running_var = jnp.ones((out_planes,), jnp.float32)
    return w1, w2, gamma, beta, running_mean, running_var


def _reference(x, w1, w2, gamma, beta, rm, rv):
    """Pure-JAX reference (inference-mode BN, exact softmax)."""
    pooled = jnp.mean(x, axis=(2, 3))                              # (N, C_in)
    h = pooled @ w1.T
    h = (h - rm) / jnp.sqrt(rv + _BN_EPS) * gamma + beta
    h = jnp.maximum(h, 0.0)
    y = h @ w2.T
    y = jax.nn.softmax(y, axis=-1)
    return y[:, :, None, None]


if __name__ == "__main__":
    # Small shapes consistent with the module.
    N, C_in, H, W = 2, 4, 16, 16
    out_planes, num_features = 8, 4        # C_mid, C_out

    key = jax.random.PRNGKey(0)
    kx, kp, kbn, kx2 = jax.random.split(key, 4)
    x = jax.random.normal(kx, (N, C_in, H, W), jnp.float32)
    w1, w2, gamma, beta, rm, rv = _init_params(kp, C_in, out_planes, num_features)

    # Non-trivial BN stats (as after training) so the inference-BN path is exercised.
    k1, k2, k3, k4 = jax.random.split(kbn, 4)
    gamma = 1.0 + 0.1 * jax.random.normal(k1, (out_planes,), jnp.float32)
    beta = 0.1 * jax.random.normal(k2, (out_planes,), jnp.float32)
    rm = 0.1 * jax.random.normal(k3, (out_planes,), jnp.float32)
    rv = 1.0 + 0.2 * jax.random.uniform(k4, (out_planes,), jnp.float32)
    params = (w1, w2, gamma, beta, rm, rv)

    ref = _reference(x, *params)

    # 1) Auto-tiled run (single full tile, 2 independent 128-lane partials).
    out = jax.block_until_ready(scale_channel_attention(x, *params))
    assert out.shape == (N, num_features, 1, 1)
    assert jnp.allclose(out, ref, atol=1e-4, rtol=1e-4), "mismatch vs reference"
    assert jnp.allclose(jnp.sum(out, axis=1), 1.0, atol=1e-5), "softmax rows must sum to 1"

    # 2) Forced small HW tile: multi-tile spatial reduction + the parallel
    #    HW-split grid axis (n_splits=2) used for v7x when N*C_in is small.
    out2 = jax.block_until_ready(scale_channel_attention(x, *params, hw_block=128))
    assert jnp.allclose(out2, ref, atol=1e-4, rtol=1e-4), "mismatch vs reference (split)"

    # 3) Ragged spatial extent (18*18=324, hw_block=128 -> 3 tiles, split=2 covers
    #    4): exercises the in-kernel iota mask on the ragged last tile AND the
    #    clamped fully-out-of-range overshoot tile (no wrapper jnp.pad anywhere).
    xb = jax.random.normal(kx2, (N, C_in, 18, 18), jnp.float32)
    refb = _reference(xb, *params)
    outb = jax.block_until_ready(scale_channel_attention(xb, *params, hw_block=128))
    assert jnp.allclose(outb, refb, atol=1e-4, rtol=1e-4), "mismatch vs reference (ragged)"

    # 4) Tiny spatial extent (< 128 lanes): single full-width-tile path.
    xc = jax.random.normal(kx2, (1, C_in, 9, 9), jnp.float32)
    refc = _reference(xc, *params)
    outc = jax.block_until_ready(scale_channel_attention(xc, *params))
    assert jnp.allclose(outc, refc, atol=1e-4, rtol=1e-4), "mismatch vs reference (tiny HW)"

    print("KERNEL_OK")
</pallas_src>

<mosaic_0001>
module attributes {stable_mosaic.version = 11 : i64} {
  func.func @_pool_sum_kernel(%arg0: i32, %arg1: i32, %arg2: i32, %arg3: memref<8x256xf32, #tpu.memory_space<vmem>>, %arg4: memref<1x8x128xf32, #tpu.memory_space<vmem>>) attributes {dimension_semantics = [#tpu.dimension_semantics<parallel>, #tpu.dimension_semantics<parallel>, #tpu.dimension_semantics<arbitrary>], iteration_bounds = array<i64: 1, 1, 1>, scalar_prefetch = 0 : i64, scratch_operands = 0 : i64, tpu.core_type = #tpu.core_type<tc>, window_params = [{transform_indices = @transform_0, window_bounds = array<i64: 8, 256>}, {transform_indices = @transform_1, window_bounds = array<i64: 1, 8, 128>}]} {
    %c0_i32 = arith.constant 0 : i32
    %0 = arith.cmpi eq, %arg2, %c0_i32 : i32
    %1 = arith.extui %0 : i1 to i32
    %c0_i32_0 = arith.constant 0 : i32
    %2 = arith.cmpi ne, %1, %c0_i32_0 : i32
    scf.if %2 {
      %cst_11 = arith.constant 0.000000e+00 : f32
      %23 = vector.broadcast %cst_11 : f32 to vector<1x8x128xf32>
      %c0_12 = arith.constant 0 : index
      %c0_13 = arith.constant 0 : index
      %c0_14 = arith.constant 0 : index
      %24 = vector.load %arg4[%c0_12, %c0_13, %c0_14] : memref<1x8x128xf32, #tpu.memory_space<vmem>>, vector<1x8x128xf32>
      tpu.vector_store %arg4[%c0_12, %c0_13, %c0_14], %23 {strides = array<i32>} : memref<1x8x128xf32, #tpu.memory_space<vmem>>, vector<1x8x128xf32>,
    } else {
    }
    %cst = arith.constant 0.000000e+00 : f32
    %3 = vector.broadcast %cst : f32 to vector<8x128xf32>
    %cst_1 = arith.constant 0.000000e+00 : f32
    %4 = vector.broadcast %cst_1 : f32 to vector<8x128xf32>
    %c0_i32_2 = arith.constant 0 : i32
    %c256_i32 = arith.constant 256 : i32
    %5 = arith.muli %c0_i32_2, %c256_i32 : i32
    %c0_i32_3 = arith.constant 0 : i32
    %6 = arith.addi %5, %c0_i32_3 : i32
    %7 = tpu.assume_multiple %6, 128 : i32
    %c0 = arith.constant 0 : index
    %8 = arith.index_cast %7 : i32 to index
    %9 = vector.load %arg3[%c0, %8] : memref<8x256xf32, #tpu.memory_space<vmem>>, vector<8x128xf32>
    %10 = arith.addf %3, %9 : vector<8x128xf32>
    %c128_i32 = arith.constant 128 : i32
    %11 = arith.addi %5, %c128_i32 : i32
    %12 = tpu.assume_multiple %11, 128 : i32
    %c0_4 = arith.constant 0 : index
    %13 = arith.index_cast %12 : i32 to index
    %14 = vector.load %arg3[%c0_4, %13] : memref<8x256xf32, #tpu.memory_space<vmem>>, vector<8x128xf32>
    %15 = arith.addf %4, %14 : vector<8x128xf32>
    %c1_i32 = arith.constant 1 : i32
    %16 = arith.addf %10, %15 : vector<8x128xf32>
    %c0_5 = arith.constant 0 : index
    %c0_6 = arith.constant 0 : index
    %c0_7 = arith.constant 0 : index
    %17 = vector.load %arg4[%c0_5, %c0_6, %c0_7] : memref<1x8x128xf32, #tpu.memory_space<vmem>>, vector<1x8x128xf32>
    %18 = vector.shape_cast %17 : vector<1x8x128xf32> to vector<8x128xf32>
    %19 = arith.addf %18, %16 : vector<8x128xf32>
    %c0_8 = arith.constant 0 : index
    %c0_9 = arith.constant 0 : index
    %c0_10 = arith.constant 0 : index
    %20 = vector.load %arg4[%c0_8, %c0_9, %c0_10] : memref<1x8x128xf32, #tpu.memory_space<vmem>>, vector<1x8x128xf32>
    %21 = vector.shape_cast %20 : vector<1x8x128xf32> to vector<8x128xf32>
    %22 = vector.shape_cast %19 : vector<8x128xf32> to vector<1x8x128xf32>
    tpu.vector_store %arg4[%c0_8, %c0_9, %c0_10], %22 {strides = array<i32>} : memref<1x8x128xf32, #tpu.memory_space<vmem>>, vector<1x8x128xf32>,
    return
  }
  func.func @transform_0(%arg0: i32, %arg1: i32, %arg2: i32) -> (i32, i32) {
    %c1_i32 = arith.constant 1 : i32
    %0 = arith.muli %arg1, %c1_i32 : i32
    %1 = arith.addi %0, %arg2 : i32
    %c0_i32 = arith.constant 0 : i32
    return %arg0, %1 : i32, i32
  }
  func.func @transform_1(%arg0: i32, %arg1: i32, %arg2: i32) -> (i32, i32, i32) {
    %c0_i32 = arith.constant 0 : i32
    %c0_i32_0 = arith.constant 0 : i32
    return %arg1, %arg0, %c0_i32 : i32, i32, i32
  }
}

</mosaic_0001>

<bundles_post_ra>
// kernel: tpu_custom_call.1
= control target key start
LH: loop header
LB: loop body
LE: loop exit
PB: predicated region body
PF: predicated region fallthrough
CT: control target
= control target key end

     0   :  { %6 = vsyncpa [#allocation3], 0  ;;  %s143_s0 = inlined_call_operand.hbm [shape: f32[8,256], index: 0, kind: input, shape index: {}]   ;;  %s144_s1 = inlined_call_operand.hbm [shape: f32[1,8,128], index: 1, kind: output, shape index: {}]  }
   0x1   :  { %7 = vsyncpa [#allocation4], 0  ;;  %s107_s6 = smov [#allocation2]   ;;  %s59_s10 = scalar_lea.hbm %s143_s0, 256 }
   0x2   :  { %s18_s7 = sshll.u32 %s107_s6, 4  ;;  %p60_p0 = scmp.ne.s32.totalorder %s143_s0, %s59_s10  ;;  %s19_s7 = int_to_ptr.vmem [resolvable:$true] %s18_s7 }
   0x3   :  { %p63_p1 = scmp.lt.u32.totalorder %s59_s10, %s143_s0 }
   0x5   :  { %p65_p2 = pnand %p63_p1, %p60_p0 }
   0x7   :  { %68 = shalt.err (!%p65_p2)
}
   0x8   :  { %s69_s15 = scalar_lea.vmem %s19_s7, 256  ;;  %p74_p4 = scmp.lt.s32.totalorder %s19_s7, %s19_s7 }
   0x9   :  { %p70_p3 = scmp.ne.s32.totalorder %s19_s7, %s69_s15  ;;  %p75_p5 = scmp.lt.s32.totalorder %s69_s15, %s69_s15 }
   0xb   :  { %p76_p6 = por %p75_p5, %p74_p4 }
   0xd   :  { %p77_p7 = pnand %p76_p6, %p70_p3 }
   0xf   :  { %80 = shalt.err (!%p77_p7)
}
  0x10   :  { %21 = dma.hbm_to_vmem [thread:$0]  %s143_s0, 256, %s19_s7, [#allocation3]  }
  0x11   :  { %103 = dma.done.wait [#allocation3], 256  }
  0x12   :  { %104 = vsyncadd [#allocation3], 4294967040  ;;  %v32_v0 = vld [vmem:[#allocation2] sm:$0xff]  ;;  %v35_v1 = vld [vmem:[#allocation2 + $0x8] sm:$0xff]  ;;  %s108_s18 = smov [#allocation5]  }
  0x13   :  { %s47_s19 = sshll.u32 %s108_s18, 4  ;;  %v37_v2 = vadd.f32 %v35_v1, %v32_v0  ;;  %s48_s19 = int_to_ptr.vmem [resolvable:$true] %s47_s19 }
  0x14   :  { %s81_s20 = scalar_lea.vmem %s48_s19, 128  ;;  %p86_p9 = scmp.lt.s32.totalorder %s48_s19, %s48_s19 }
  0x15   :  { %40 = vst [vmem:[#allocation5] sm:$0xff] %v37_v2  ;;  %p82_p8 = scmp.ne.s32.totalorder %s48_s19, %s81_s20  ;;  %p87_p10 = scmp.lt.s32.totalorder %s81_s20, %s81_s20 }
  0x17   :  { %p88_p11 = por %p87_p10, %p86_p9 }
  0x19   :  { %p89_p12 = pnand %p88_p11, %p82_p8 }
  0x1b   :  { %92 = shalt.err (!%p89_p12)
}
  0x1c   :  { %s93_s0 = scalar_lea.hbm %s144_s1, 128 }
  0x1d   :  { %p94_p13 = scmp.ne.s32.totalorder %s144_s1, %s93_s0  ;;  %p97_p0 = scmp.lt.u32.totalorder %s93_s0, %s144_s1 }
  0x1f   :  { %p99_p1 = pnand %p97_p0, %p94_p13 }
  0x21   :  { %102 = shalt.err (!%p99_p1)
}
  0x22   :  { %50 = dma.vmem_to_hbm [thread:$0]  %s48_s19, 128, %s144_s1, [#allocation4]  }
  0x23   :  { %105 = dma.done.wait [#allocation4], 128  }
  0x24   :  { %106 = vsyncadd [#allocation4], 4294967168 }
  0x25   :  { %54 = vsyncpa [#allocation3], 1 }
  0x26   :  { %55 = vsyncpa [#allocation4], 1 }

</bundles_post_ra>
